<compile_context>
chip_gen: v7x
topology: tpu7x:2x2x1
jax: 0.10.0
libtpu: 0.0.40
codegen_flags: <defaults>
</compile_context>

<pallas_src>
import functools
import math

import jax
import jax.numpy as jnp
from jax import lax
from jax.experimental import pallas as pl
from jax.experimental.pallas import tpu as pltpu

_EPS = 1e-7


def _cdiv(a, b):
    return -(-a // b)


def _round_down(a, b):
    return (a // b) * b


def _vmem_capacity():
    try:
        return int(pltpu.get_tpu_info().vmem_capacity_bytes)
    except Exception:
        return 64 * 1024 * 1024          # conservative (v7x-sized) fallback


# --------------------------------------------------------------------------
# Path A: lane-dense flat kernel for small K (< 128 columns).
# --------------------------------------------------------------------------
def _flat_kernel(flat_ref, col0_ref, out_ref, acc_ref, *,
                 c, log_mpn, eps, bsz, n_valid, tile_r, needs_mask):
    i = pl.program_id(0)

    @pl.when(i == 0)
    def _init():
        acc_ref[...] = jnp.zeros_like(acc_ref)

    xf = flat_ref[...].astype(jnp.float32)               # (tile_r, 128)
    # Every element contributes  log(m*Pn) - log(x + c)  (log_D0 for negatives;
    # the positive column is corrected in the finalize).
    t = log_mpn - jnp.log(xf + c)
    if needs_mask:  # static: only emitted when the padded extent != N
        idx = (i * (tile_r * 128)
               + lax.broadcasted_iota(jnp.int32, (tile_r, 128), 0) * 128
               + lax.broadcasted_iota(jnp.int32, (tile_r, 128), 1))
        # where AFTER the log: any NaN/Inf from pad garbage is zeroed here.
        t = jnp.where(idx < n_valid, t, 0.0)

    if tile_r % 8 == 0:
        acc_ref[...] += jnp.sum(t.reshape(tile_r // 8, 8, 128), axis=0)
    else:                                                 # tiny inputs only
        acc_ref[0:tile_r, :] = acc_ref[0:tile_r, :] + t

    @pl.when(i == pl.num_programs(0) - 1)
    def _finalize():
        # Positive-column correction: swap the bulk col-0 term for log_D1.
        p_raw = col0_ref[...].astype(jnp.float32)         # (1, bsz)
        p_eps = jnp.where(p_raw == 0.0, eps, p_raw)
        corr = (jnp.log(p_eps) - jnp.log(p_eps + c)
                - log_mpn + jnp.log(p_raw + c))
        total = jnp.sum(acc_ref[...]) + jnp.sum(corr)
        out_ref[0] = -total / float(bsz)


def _small_k_call(x, *, bsz, kp1, c, log_mpn, vmem_cap):
    dtype = x.dtype
    itemsize = jnp.dtype(dtype).itemsize
    sub_mult = max(8, 32 // itemsize)

    n = bsz * kp1
    r = _cdiv(n, 128)
    flat = x.reshape(-1)
    pad = r * 128 - n
    if pad:
        flat = jnp.pad(flat, (0, pad), constant_values=1.0)   # masked in-kernel
    flat2d = flat.reshape(r, 128)
    # TODO(synk): for gigantic bsz, pack col0 lane-dense as well (the (1, bsz)
    # resident block costs ~32*bsz bytes of VMEM due to sublane padding).
    col0 = x[:, 0].reshape(1, bsz)

    # VMEM accounting with lane padding: flat rows are exactly 128 lanes wide.
    budget = int(0.45 * vmem_cap)
    col0_bytes = 8 * _cdiv(bsz, 128) * 128 * itemsize
    per_row = 128 * (2 * itemsize + 4 * 4)        # 2x input (dbl-buf) + 4 f32 temps
    rows_vmem = max(sub_mult, (budget - col0_bytes) // per_row)
    rows_pipe = max(sub_mult, _round_down(r // 4, sub_mult))   # keep >= ~4 steps
    rows_abs = 16384                                           # ~8 MiB f32 / block

    if r <= sub_mult:
        tile_r = r
    else:
        tile_r = max(sub_mult,
                     _round_down(min(r, rows_vmem, rows_pipe, rows_abs), sub_mult))
    nr = _cdiv(r, tile_r)
    needs_mask = (nr * tile_r * 128) != n

    need = tile_r * per_row + col0_bytes + (2 << 20)
    vmem_limit = int(min(max(32 << 20, need), 0.7 * vmem_cap))

    kernel = functools.partial(
        _flat_kernel, c=c, log_mpn=log_mpn, eps=_EPS, bsz=bsz,
        n_valid=n, tile_r=tile_r, needs_mask=needs_mask)

    # TODO(synk): sweep pipeline_mode=pl.Buffered(3) for the <512 KiB-block regime.
    return pl.pallas_call(
        kernel,
        out_shape=jax.ShapeDtypeStruct((1,), jnp.float32),
        grid=(nr,),
        in_specs=[
            pl.BlockSpec((tile_r, 128), lambda i: (i, 0)),
            pl.BlockSpec((1, bsz), lambda i: (0, 0)),     # resident, fetched once
        ],
        out_specs=pl.BlockSpec(memory_space=pltpu.SMEM),  # scalar result
        scratch_shapes=[pltpu.VMEM((8, 128), jnp.float32)],
        compiler_params=pltpu.CompilerParams(
            dimension_semantics=("arbitrary",),           # single scalar accumulator
            vmem_limit_bytes=vmem_limit,
        ),
    )(flat2d, col0)


# --------------------------------------------------------------------------
# Path B: 2-D (batch, K) streaming kernel for wide inputs (K+1 >= 128).
# --------------------------------------------------------------------------
def _wide_kernel(x_ref, out_ref, acc_ref, *,
                 c, log_mpn, eps, bsz, kp1, tile_b, tile_k,
                 mask_rows, mask_cols):
    i = pl.program_id(0)          # batch tile (slow axis)
    j = pl.program_id(1)          # K tile (fast axis, reduction)

    @pl.when((i == 0) & (j == 0))
    def _init():
        acc_ref[...] = jnp.zeros_like(acc_ref)

    row_ok = None
    if mask_rows:
        rid = i * tile_b + lax.broadcasted_iota(jnp.int32, (tile_b, 128), 0)
        row_ok = rid < bsz
    lane = (lax.broadcasted_iota(jnp.int32, (tile_b, 128), 1)
            if mask_cols else None)

    # Fused log + lane fold over 128-lane chunks of the block: the only live
    # f32 temporaries are (tile_b, 128) slabs, never the whole block.
    base_col = j * tile_k
    lf = None
    for s in range(tile_k // 128):
        xs = x_ref[:, s * 128:(s + 1) * 128].astype(jnp.float32)
        ts = log_mpn - jnp.log(xs + c)
        ok = row_ok
        if mask_cols:
            cok = (base_col + s * 128 + lane) < kp1
            ok = cok if ok is None else (ok & cok)
        if ok is not None:
            ts = jnp.where(ok, ts, 0.0)   # where AFTER the log: kills NaN/Inf
        lf = ts if lf is None else lf + ts

    if tile_b % 8 == 0:
        acc_ref[...] += jnp.sum(lf.reshape(tile_b // 8, 8, 128), axis=0)
    else:                                 # only reachable when bsz < 8
        acc_ref[0:tile_b, :] = acc_ref[0:tile_b, :] + lf

    # Positive-column correction: only the j == 0 block holds column 0.
    @pl.when(j == 0)
    def _pos():
        p_raw = x_ref[:, 0:1].astype(jnp.float32)          # (tile_b, 1)
        p_eps = jnp.where(p_raw == 0.0, eps, p_raw)
        corr = (jnp.log(p_eps) - jnp.log(p_eps + c)
                - log_mpn + jnp.log(p_raw + c))
        if mask_rows:
            rid1 = i * tile_b + lax.broadcasted_iota(jnp.int32, (tile_b, 1), 0)
            corr = jnp.where(rid1 < bsz, corr, 0.0)
        if tile_b % 8 == 0:
            acc_ref[:, 0:1] = acc_ref[:, 0:1] + jnp.sum(
                corr.reshape(tile_b // 8, 8, 1), axis=0)
        else:
            acc_ref[0:tile_b, 0:1] = acc_ref[0:tile_b, 0:1] + corr

    @pl.when((i == pl.num_programs(0) - 1) & (j == pl.num_programs(1) - 1))
    def _finalize():
        total = jnp.sum(acc_ref[...])
        out_ref[0] = -total / float(bsz)


def _wide_call(x, *, bsz, kp1, c, log_mpn, vmem_cap):
    dtype = x.dtype
    itemsize = jnp.dtype(dtype).itemsize
    sub_mult = max(8, 32 // itemsize)

    # In-flight VMEM budget: double-buffered input + ~4 f32 temporaries per
    # element, targeting <= 45% of physical VMEM (v7x has only 64 MiB).
    budget = int(0.45 * vmem_cap)
    per_elem = 2 * itemsize + 4 * 4
    target_elems = min(budget // per_elem, 1 << 20)       # <= ~4 MiB f32 input/block

    # K tiling: lane-aligned blocks (multiple of 128) bound VMEM independently
    # of K and remove any sub-128-lane tail path; the ragged tail is masked.
    kpad = _round_down(kp1, 128)                           # >= 128 here
    row_target = min(bsz, 1024)                            # >=512 rows ~ HBM roofline
    tile_k = max(128, min(kpad, 8192,
                          _round_down(target_elems // max(1, row_target), 128)))
    nk = _cdiv(kp1, tile_k)

    rows_vmem = max(sub_mult, target_elems // tile_k)
    # Keep the overall grid at >= ~4 steps so the DMA overlaps the compute.
    desired = 4
    rows_pipe = bsz if nk >= desired else max(sub_mult, bsz // _cdiv(desired, nk))

    if bsz <= sub_mult:
        tile_b = bsz
    else:
        tile_b = max(sub_mult,
                     _round_down(min(bsz, rows_vmem, rows_pipe), sub_mult))
    nb = _cdiv(bsz, tile_b)

    mask_rows = (bsz % tile_b) != 0
    mask_cols = (kp1 % tile_k) != 0

    need = tile_b * tile_k * per_elem + (2 << 20)
    vmem_limit = int(min(max(32 << 20, need), 0.7 * vmem_cap))

    kernel = functools.partial(
        _wide_kernel, c=c, log_mpn=log_mpn, eps=_EPS, bsz=bsz, kp1=kp1,
        tile_b=tile_b, tile_k=tile_k, mask_rows=mask_rows, mask_cols=mask_cols)

    return pl.pallas_call(
        kernel,
        out_shape=jax.ShapeDtypeStruct((1,), jnp.float32),
        grid=(nb, nk),
        in_specs=[pl.BlockSpec((tile_b, tile_k), lambda i, j: (i, j))],
        out_specs=pl.BlockSpec(memory_space=pltpu.SMEM),   # scalar result
        scratch_shapes=[pltpu.VMEM((8, 128), jnp.float32)],
        compiler_params=pltpu.CompilerParams(
            # TODO(synk): on v7x, shard the batch axis across both TensorCores
            # with per-core partial sums; the single accumulator + last-step
            # finalize below is not safe under "parallel"/core sharding.
            dimension_semantics=("arbitrary", "arbitrary"),
            vmem_limit_bytes=vmem_limit,
        ),
    )(x)


# --------------------------------------------------------------------------
# Public entry point.
# --------------------------------------------------------------------------
def contrast_loss(x, n_data):
    """Pallas implementation of ContrastLoss(n_data).forward(x). Returns (1,)."""
    # Glue: CRD passes (bsz, K+1, 1); collapse the trailing singleton dim.
    if x.ndim == 3 and x.shape[-1] == 1:
        x = x.reshape(x.shape[0], x.shape[1])
    assert x.ndim == 2, "expected (bsz, K+1) or (bsz, K+1, 1) input"
    bsz, kp1 = x.shape
    m = kp1 - 1
    pn = 1.0 / float(n_data)
    m_pn = float(m) * pn
    c = m_pn + _EPS
    # log(m*Pn) is folded per element inside the kernel (not a bsz*m*log(m*Pn)
    # constant in the finalize) to avoid large-magnitude cancellation.
    log_mpn = math.log(m_pn) if m > 0 else 0.0
    vmem_cap = _vmem_capacity()

    if kp1 < 128:
        return _small_k_call(x, bsz=bsz, kp1=kp1, c=c, log_mpn=log_mpn,
                             vmem_cap=vmem_cap)
    return _wide_call(x, bsz=bsz, kp1=kp1, c=c, log_mpn=log_mpn,
                      vmem_cap=vmem_cap)


def _reference(x, n_data):
    """Pure-JAX reference mirroring the PyTorch forward, for verification."""
    if x.ndim == 3 and x.shape[-1] == 1:
        x = x.reshape(x.shape[0], x.shape[1])
    bsz, kp1 = x.shape
    m = kp1 - 1
    eps = 1e-7
    pn = 1.0 / float(n_data)
    xf = x.astype(jnp.float32)
    p_pos = xf[:, 0]
    p_pos = jnp.where(p_pos == 0.0, eps, p_pos)
    log_d1 = jnp.log(p_pos / (p_pos + m * pn + eps))
    p_neg = xf[:, 1:]
    log_d0 = jnp.log((m * pn) / (p_neg + m * pn + eps))
    loss = -(jnp.sum(log_d1) + jnp.sum(log_d0)) / bsz
    return loss.reshape(1)


if __name__ == "__main__":
    key = jax.random.PRNGKey(0)
    k1, k2, k3 = jax.random.split(key, 3)

    # Case 1: CRD-style small-K input (bsz, K+1, 1) -> lane-dense flat path.
    x1 = jax.random.uniform(k1, (16, 17, 1), dtype=jnp.float32,
                            minval=0.0, maxval=1.0)
    x1 = x1.at[0, 0, 0].set(0.0)      # exercise the P_pos == 0 -> eps branch
    out1 = jax.block_until_ready(contrast_loss(x1, 1000))
    ref1 = jax.block_until_ready(_reference(x1, 1000))
    assert out1.shape == (1,)
    assert jnp.allclose(out1, ref1, rtol=1e-4, atol=1e-4), (out1, ref1)

    # Case 2: wide-K input -> 2-D (batch, K) path with masked row & col tails.
    x2 = jax.random.uniform(k2, (20, 257), dtype=jnp.float32,
                            minval=0.0, maxval=1.0)
    x2 = x2.at[3, 0].set(0.0)
    out2 = jax.block_until_ready(contrast_loss(x2, 5000))
    ref2 = jax.block_until_ready(_reference(x2, 5000))
    assert out2.shape == (1,)
    assert jnp.allclose(out2, ref2, rtol=1e-4, atol=1e-4), (out2, ref2)

    # Case 3: tiny batch (< 8 rows), aligned K -> full-dim batch block path.
    x3 = jax.random.uniform(k3, (4, 384), dtype=jnp.float32,
                            minval=0.0, maxval=1.0)
    x3 = x3.at[1, 0].set(0.0)
    out3 = jax.block_until_ready(contrast_loss(x3, 2000))
    ref3 = jax.block_until_ready(_reference(x3, 2000))
    assert out3.shape == (1,)
    assert jnp.allclose(out3, ref3, rtol=1e-4, atol=1e-4), (out3, ref3)

    print("KERNEL_OK")
</pallas_src>

<mosaic_0001>
module attributes {stable_mosaic.version = 11 : i64} {
  func.func @_flat_kernel(%arg0: i32, %arg1: memref<3x128xf32, #tpu.memory_space<vmem>>, %arg2: memref<1x16xf32, #tpu.memory_space<vmem>>, %arg3: memref<1xf32, #tpu.memory_space<smem>>, %arg4: memref<8x128xf32, #tpu.memory_space<vmem>>) attributes {dimension_semantics = [#tpu.dimension_semantics<arbitrary>], iteration_bounds = array<i64: 1>, scalar_prefetch = 0 : i64, scratch_operands = 1 : i64, tpu.core_type = #tpu.core_type<tc>, window_params = [{transform_indices = @transform_0, window_bounds = array<i64: 3, 128>}, {pipeline_mode = #tpu.pipeline_mode<synchronous>, transform_indices = @transform_1, window_bounds = array<i64: 1, 16>}, {transform_indices = @transform_2, window_bounds = array<i64: 1>}]} {
    %c0_i32 = arith.constant 0 : i32
    %0 = arith.cmpi eq, %arg0, %c0_i32 : i32
    %1 = arith.extui %0 : i1 to i32
    %c0_i32_0 = arith.constant 0 : i32
    %2 = arith.cmpi ne, %1, %c0_i32_0 : i32
    scf.if %2 {
      %cst_10 = arith.constant 0.000000e+00 : f32
      %27 = vector.broadcast %cst_10 : f32 to vector<8x128xf32>
      %c0_11 = arith.constant 0 : index
      %c0_12 = arith.constant 0 : index
      %28 = vector.load %arg4[%c0_11, %c0_12] : memref<8x128xf32, #tpu.memory_space<vmem>>, vector<8x128xf32>
      tpu.vector_store %arg4[%c0_11, %c0_12], %27 {strides = array<i32>} : memref<8x128xf32, #tpu.memory_space<vmem>>, vector<8x128xf32>,
    } else {
    }
    %c0 = arith.constant 0 : index
    %c0_1 = arith.constant 0 : index
    %3 = vector.load %arg1[%c0, %c0_1] : memref<3x128xf32, #tpu.memory_space<vmem>>, vector<3x128xf32>
    %cst = arith.constant 1.600010e-02 : f32
    %4 = vector.broadcast %cst : f32 to vector<3x128xf32>
    %5 = arith.addf %3, %4 : vector<3x128xf32>
    %6 = math.log %5 : vector<3x128xf32>
    %cst_2 = arith.constant -4.13516665 : f32
    %7 = vector.broadcast %cst_2 : f32 to vector<3x128xf32>
    %8 = arith.subf %7, %6 : vector<3x128xf32>
    %c384_i32 = arith.constant 384 : i32
    %9 = arith.muli %arg0, %c384_i32 : i32
    %10 = tpu.iota {dimensions = array<i32: 0>} : vector<3x128xi32>
    %c128_i32 = arith.constant 128 : i32
    %11 = vector.broadcast %c128_i32 : i32 to vector<3x128xi32>
    %12 = arith.muli %10, %11 : vector<3x128xi32>
    %13 = vector.broadcast %9 : i32 to vector<3x128xi32>
    %14 = arith.addi %13, %12 : vector<3x128xi32>
    %15 = tpu.iota {dimensions = array<i32: 1>} : vector<3x128xi32>
    %16 = arith.addi %14, %15 : vector<3x128xi32>
    %c272_i32 = arith.constant 272 : i32
    %17 = vector.broadcast %c272_i32 : i32 to vector<3x128xi32>
    %18 = arith.cmpi slt, %16, %17 : vector<3x128xi32>
    %cst_3 = arith.constant 0.000000e+00 : f32
    %19 = vector.broadcast %cst_3 : f32 to vector<3x128xf32>
    %20 = arith.select %18, %8, %19 : vector<3x128xi1>, vector<3x128xf32>
    %c0_4 = arith.constant 0 : index
    %c0_5 = arith.constant 0 : index
    %21 = vector.load %arg4[%c0_4, %c0_5] : memref<8x128xf32, #tpu.memory_space<vmem>>, vector<3x128xf32>
    %22 = arith.addf %21, %20 : vector<3x128xf32>
    %c0_6 = arith.constant 0 : index
    %c0_7 = arith.constant 0 : index
    %23 = vector.load %arg4[%c0_6, %c0_7] : memref<8x128xf32, #tpu.memory_space<vmem>>, vector<3x128xf32>
    tpu.vector_store %arg4[%c0_6, %c0_7], %22 {strides = array<i32>} : memref<8x128xf32, #tpu.memory_space<vmem>>, vector<3x128xf32>,
    %c0_i32_8 = arith.constant 0 : i32
    %24 = arith.cmpi eq, %arg0, %c0_i32_8 : i32
    %25 = arith.extui %24 : i1 to i32
    %c0_i32_9 = arith.constant 0 : i32
    %26 = arith.cmpi ne, %25, %c0_i32_9 : i32
    scf.if %26 {
      %c0_10 = arith.constant 0 : index
      %c0_11 = arith.constant 0 : index
      %27 = vector.load %arg2[%c0_10, %c0_11] : memref<1x16xf32, #tpu.memory_space<vmem>>, vector<1x16xf32>
      %cst_12 = arith.constant 0.000000e+00 : f32
      %28 = vector.broadcast %cst_12 : f32 to vector<1x16xf32>
      %29 = arith.cmpf oeq, %27, %28 : vector<1x16xf32>
      %cst_13 = arith.constant 1.000000e-07 : f32
      %30 = vector.broadcast %cst_13 : f32 to vector<1x16xf32>
      %31 = arith.select %29, %30, %27 : vector<1x16xi1>, vector<1x16xf32>
      %32 = math.log %31 : vector<1x16xf32>
      %cst_14 = arith.constant 1.600010e-02 : f32
      %33 = vector.broadcast %cst_14 : f32 to vector<1x16xf32>
      %34 = arith.addf %31, %33 : vector<1x16xf32>
      %35 = math.log %34 : vector<1x16xf32>
      %36 = arith.subf %32, %35 : vector<1x16xf32>
      %cst_15 = arith.constant -4.13516665 : f32
      %37 = vector.broadcast %cst_15 : f32 to vector<1x16xf32>
      %38 = arith.subf %36, %37 : vector<1x16xf32>
      %cst_16 = arith.constant 1.600010e-02 : f32
      %39 = vector.broadcast %cst_16 : f32 to vector<1x16xf32>
      %40 = arith.addf %27, %39 : vector<1x16xf32>
      %41 = math.log %40 : vector<1x16xf32>
      %42 = arith.addf %38, %41 : vector<1x16xf32>
      %c0_17 = arith.constant 0 : index
      %c0_18 = arith.constant 0 : index
      %43 = vector.load %arg4[%c0_17, %c0_18] : memref<8x128xf32, #tpu.memory_space<vmem>>, vector<8x128xf32>
      %44 = vector.shape_cast %43 : vector<8x128xf32> to vector<1x8x128xf32>
      %cst_19 = arith.constant dense<0.000000e+00> : vector<1xf32>
      %45 = vector.multi_reduction <add>, %44, %cst_19 [1, 2] : vector<1x8x128xf32> to vector<1xf32>
      %46 = vector.shape_cast %45 : vector<1xf32> to vector<1x1x1xf32>
      %47 = vector.extract %46[0, 0, 0] : f32 from vector<1x1x1xf32>
      %48 = vector.shape_cast %42 : vector<1x16xf32> to vector<1x1x16xf32>
      %cst_20 = arith.constant dense<0.000000e+00> : vector<1xf32>
      %49 = vector.multi_reduction <add>, %48, %cst_20 [1, 2] : vector<1x1x16xf32> to vector<1xf32>
      %50 = vector.shape_cast %49 : vector<1xf32> to vector<1x1x1xf32>
      %51 = vector.extract %50[0, 0, 0] : f32 from vector<1x1x1xf32>
      %52 = arith.addf %47, %51 : f32
      %cst_21 = arith.constant 0.000000e+00 : f32
      %53 = arith.subf %cst_21, %52 : f32
      %cst_22 = arith.constant 1.600000e+01 : f32
      %54 = arith.divf %53, %cst_22 : f32
      %c0_23 = arith.constant 0 : index
      %55 = memref.load %arg3[%c0_23] : memref<1xf32, #tpu.memory_space<smem>>
      memref.store %54, %arg3[%c0_23] : memref<1xf32, #tpu.memory_space<smem>>
    } else {
    }
    return
  }
  func.func @transform_0(%arg0: i32) -> (i32, i32) {
    %c0_i32 = arith.constant 0 : i32
    %c0_i32_0 = arith.constant 0 : i32
    return %arg0, %c0_i32 : i32, i32
  }
  func.func @transform_1(%arg0: i32) -> (i32, i32) {
    %c0_i32 = arith.constant 0 : i32
    %c0_i32_0 = arith.constant 0 : i32
    %c0_i32_1 = arith.constant 0 : i32
    return %c0_i32, %c0_i32_0 : i32, i32
  }
  func.func @transform_2(%arg0: i32) -> i32 {
    %c0_i32 = arith.constant 0 : i32
    %c0_i32_0 = arith.constant 0 : i32
    return %c0_i32 : i32
  }
}

</mosaic_0001>

<bundles_post_ra>
// kernel: tpu_custom_call.1
= control target key start
LH: loop header
LB: loop body
LE: loop exit
PB: predicated region body
PF: predicated region fallthrough
CT: control target
= control target key end

     0   :  { %7 = vsyncpa [#allocation4], 0  ;;  %s204_s0 = inlined_call_operand.hbm [shape: f32[3,128], index: 0, kind: input, shape index: {}]   ;;  %s205_s1 = inlined_call_operand.vmem [shape: f32[1,16], index: 1, kind: input, shape index: {}]   ;;  %s206_s2 = inlined_call_operand.hbm [shape: f32[1], index: 2, kind: output, shape index: {}]  }
   0x1   :  { %8 = vsyncpa [#allocation5], 0  ;;  %s159_s9 = smov [#allocation3]   ;;  %s123_s13 = scalar_lea.hbm %s204_s0, 64 }
   0x2   :  { %s15_s10 = sshll.u32 %s159_s9, 4  ;;  %p124_p0 = scmp.ne.s32.totalorder %s204_s0, %s123_s13  ;;  %s16_s10 = int_to_ptr.vmem [resolvable:$true] %s15_s10 }
   0x3   :  { %p127_p1 = scmp.lt.u32.totalorder %s123_s13, %s204_s0 }
   0x5   :  { %p129_p2 = pnand %p127_p1, %p124_p0 }
   0x7   :  { %132 = shalt.err (!%p129_p2)
}
   0x8   :  { %s133_s18 = scalar_lea.vmem %s16_s10, 64  ;;  %p138_p4 = scmp.lt.s32.totalorder %s16_s10, %s16_s10 }
   0x9   :  { %p134_p3 = scmp.ne.s32.totalorder %s16_s10, %s133_s18  ;;  %p139_p5 = scmp.lt.s32.totalorder %s133_s18, %s133_s18 }
   0xb   :  { %p140_p6 = por %p139_p5, %p138_p4 }
   0xd   :  { %p141_p7 = pnand %p140_p6, %p134_p3 }
   0xf   :  { %144 = shalt.err (!%p141_p7)
}
  0x10   :  { %18 = dma.hbm_to_vmem [thread:$0]  %s204_s0, 64, %s16_s10, [#allocation4]  }
  0x11   :  { %155 = dma.done.wait [#allocation4], 64  }
  0x12   :  { %156 = vsyncadd [#allocation4], 4294967232  ;;  %v160_v0 = vmov 0.0   ;;  %v35_v1 = vlaneseq  ;;  %v29_v2 = vld [vmem:[#allocation3] sm:$0x7]  ;;  %vm75_vm2 = vcmask 122880  }
  0x13   :  { %28 = vst [vmem:[#allocation2] sm:$0xff] %v160_v0  ;;  %v51_v3 = vld [vmem:[%s205_s1] sm:$0x1]  ;;  %v30_v4 = vadd.f32 0.0160001, %v29_v2  ;;  %s145_s28 = scalar_lea.hbm %s206_s2, 16 }
  0x14   :  { %vm52_vm0 = vcmp.eq.f32.partialorder %v51_v3, 0.0  ;;  %v36_v6 = vshrl.u32 %v35_v1, 7  ;;  %v61_v8 = vadd.f32 0.0160001, %v51_v3  ;;  %v41_v10 = vand.u32 127, %v35_v1  ;;  %p146_p8 = scmp.ne.s32.totalorder %s206_s2, %s145_s28  ;;  %p149_p9 = scmp.lt.u32.totalorder %s145_s28, %s206_s2 }
  0x15   :  { %v53_v5 = vsel %vm52_vm0, 1e-07, %v51_v3  ;;  %115 = vlog2.f32 %v30_v4 }
  0x16   :  { %v56_v7 = vadd.f32 0.0160001, %v53_v5  ;;  %117 = vlog2.f32 %v53_v5  ;;  %v37_v9 = vmul.u32 128, %v36_v6  ;;  %p151_p10 = pnand %p149_p9, %p146_p8 }
  0x18   :  { %119 = vlog2.f32 %v56_v7  ;;  %v42_v11 = vadd.s32 %v41_v10, %v37_v9 }
  0x19   :  { %121 = vlog2.f32 %v61_v8 }
  0x1a   :  { %vm43_vm1 = vcmp.lt.s32.totalorder %v42_v11, 272  ;;  %v45_v18 = vld [vmem:[#allocation2] sm:$0x7] }
  0x1f   :  { %v116_v12 = vpop.eup %115 }
  0x20   :  { %v118_v13 = vpop.eup %117  ;;  %v32_v14 = vmul.f32 0.6931472, %v116_v12 }
  0x21   :  { %v55_v16 = vmul.f32 0.6931472, %v118_v13 }
  0x22   :  { %v120_v15 = vpop.eup %119  ;;  %v33_v17 = vsub.f32 -4.1351666, %v32_v14 }
  0x23   :  { %v58_v19 = vmul.f32 0.6931472, %v120_v15  ;;  %v122_v22 = vpop.eup %121 }
  0x24   :  { %v44_v20 = vsel %vm43_vm1, %v33_v17, 0.0  ;;  %v63_v25 = vmul.f32 0.6931472, %v122_v22 }
  0x25   :  { %v59_v21 = vsub.f32 %v55_v16, %v58_v19  ;;  %v46_v23 = vadd.f32 %v45_v18, %v44_v20 }
  0x27   :  { %47 = vst [vmem:[#allocation2] sm:$0x7] %v46_v23  ;;  %v107_v24 = vadd.f32 4.1351666, %v59_v21 }
  0x29   :  { %v64_v26 = vadd.f32 %v107_v24, %v63_v25 }
  0x2b   :  { %v76_v28 = vsel %vm75_vm2, %v64_v26, 0.0 }
  0x2e   :  { %v65_v27 = vld [vmem:[#allocation2] sm:$0xff] }
  0x2f   :  { %66 = vadd.xlane.f32.xlu0 %v65_v27 }
  0x33   :  { %77 = vadd.xlane.f32.xlu0 %v76_v28 }
  0xbc   :  { %v67_v29 = vpop.xlane.xlu0 %66 }
  0xbd   :  { %v68_v30 = vrot.slane %v67_v29, 4 }
  0xbf   :  { %v69_v31 = vadd.f32 %v68_v30, %v67_v29 }
  0xc0   :  { %v78_v32 = vpop.xlane.xlu0 %77 }
  0xc1   :  { %v70_v33 = vrot.slane %v69_v31, 2  ;;  %v79_v34 = vrot.slane %v78_v32, 4 }
  0xc3   :  { %v80_v35 = vadd.f32 %v79_v34, %v78_v32  ;;  %v71_v36 = vadd.f32 %v70_v33, %v69_v31 }
  0xc5   :  { %v81_v37 = vrot.slane %v80_v35, 2  ;;  %v72_v38 = vrot.slane %v71_v36, 1 }
  0xc7   :  { %v82_v39 = vadd.f32 %v81_v37, %v80_v35  ;;  %v73_v40 = vadd.f32 %v72_v38, %v71_v36 }
  0xc9   :  { %108 = vpush %v73_v40  ;;  %v83_v41 = vrot.slane %v82_v39, 1 }
  0xcb   :  { %v84_v42 = vadd.f32 %v83_v41, %v82_v39 }
  0xcd   :  { %110 = vpush %v84_v42 }
  0xfa   :  { %s109_s0 = spop %108 }
  0xfe   :  { %s111_s1 = spop %110 }
  0xff   :  { %s86_s23 = sadd.f32 %s111_s1, %s109_s0 }
 0x101   :  { %s87_s24 = ssub.f32 0.0, %s86_s23 }
 0x103   :  { %s90_s25 = smul.f32 0.0625, %s87_s24 }
 0x105   :  { %92 = sst [smem:[#allocation6]] %s90_s25 }
 0x106   :  { %154 = shalt.err (!%p151_p10)
}
 0x107   :  { %s161_s5 = smov [#allocation6]  }
 0x108   :  { %100 = dma.smem_to_hbm %s161_s5, 16, %s206_s2, [#allocation5]  }
 0x109   :  { %157 = dma.done.wait [#allocation5], 16  }
 0x10a   :  { %158 = vsyncadd [#allocation5], 4294967280 }
 0x10b   :  { %104 = sfence }
 0x10c   :  { %105 = vsyncpa [#allocation4], 1 }
 0x10d   :  { %106 = vsyncpa [#allocation5], 1 }

</bundles_post_ra>
